<compile_context>
chip_gen: v6e
topology: v6e:2x2x1
jax: 0.10.0
libtpu: 0.0.40
codegen_flags: <defaults>
</compile_context>

<pallas_src>
import jax
import jax.numpy as jnp
from jax.experimental import pallas as pl
from jax.experimental.pallas import tpu as pltpu

IN_FEATURES = 784
HIDDEN = 256
OUT_FEATURES = 10
OUT_PAD = 128            # lane-dense padded output width
MAX_TM = 2048            # max batch-tile rows (fits all generations' VMEM)


def _round_up(a, m):
    return ((a + m - 1) // m) * m


def _pick_tm(B):
    """Batch tile rows: multiple of 8, capped, >=2 grid steps when B > 8 (v7x)."""
    if B <= 8:
        return 8
    half = _round_up(pl.cdiv(B, 2), 8)
    return min(MAX_TM, half)


def mlp_kernel(x_ref, w1_ref, b1_ref, w2_ref, b2_ref, o_ref):
    # x: (tm, 784) f32, w1: (784, 256) bf16, b1: (1, 256) f32,
    # w2: (256, 128) bf16 (zero-padded), b2: (1, 128) f32 (zero-padded),
    # o:  (tm, 128) bf16.
    x = x_ref[...].astype(jnp.bfloat16)                      # in-kernel cast
    h = jnp.dot(x, w1_ref[...], preferred_element_type=jnp.float32)
    h = jnp.maximum(h + b1_ref[...], 0.0)                    # f32 bias + ReLU
    y = jnp.dot(h.astype(jnp.bfloat16), w2_ref[...],
                preferred_element_type=jnp.float32)
    o_ref[...] = (y + b2_ref[...]).astype(o_ref.dtype)       # bf16 store


def prepare_params(w1, b1, w2, b2):
    """One-time weight prep (do NOT call per forward).

    Inputs are stored (in, out) relative to nn.Linear (i.e. weight.T) so the
    kernel computes y = x @ W + b directly.
    """
    w1_bf16 = w1.astype(jnp.bfloat16)
    b1_f32 = b1.reshape(1, HIDDEN).astype(jnp.float32)
    w2_pad = jnp.zeros((HIDDEN, OUT_PAD), jnp.bfloat16).at[:, :OUT_FEATURES].set(
        w2.astype(jnp.bfloat16))
    b2_pad = jnp.zeros((1, OUT_PAD), jnp.float32).at[:, :OUT_FEATURES].set(
        b2.reshape(1, OUT_FEATURES).astype(jnp.float32))
    return w1_bf16, b1_f32, w2_pad, b2_pad


def simple_nn_forward_padded(x, prepared):
    """Core fused forward. x: (B, 784) f32. Returns (B, 128) bf16 (lane-padded).

    Downstream consumers (e.g. argmax / cross-entropy over the first 10
    columns) can use this directly and skip the slice pass entirely.
    """
    w1_bf16, b1_f32, w2_pad, b2_pad = prepared
    B = x.shape[0]
    tm = _pick_tm(B)
    grid = (pl.cdiv(B, tm),)

    return pl.pallas_call(
        mlp_kernel,
        out_shape=jax.ShapeDtypeStruct((B, OUT_PAD), jnp.bfloat16),
        grid=grid,
        in_specs=[
            pl.BlockSpec((tm, IN_FEATURES), lambda i: (i, 0)),      # x tile (f32)
            pl.BlockSpec((IN_FEATURES, HIDDEN), lambda i: (0, 0)),  # w1 resident
            pl.BlockSpec((1, HIDDEN), lambda i: (0, 0)),            # b1 resident
            pl.BlockSpec((HIDDEN, OUT_PAD), lambda i: (0, 0)),      # w2 resident
            pl.BlockSpec((1, OUT_PAD), lambda i: (0, 0)),           # b2 resident
        ],
        out_specs=pl.BlockSpec((tm, OUT_PAD), lambda i: (i, 0)),
        compiler_params=pltpu.CompilerParams(
            dimension_semantics=("parallel",),
            vmem_limit_bytes=64 << 20),
    )(x, w1_bf16, b1_f32, w2_pad, b2_pad)


def simple_nn_forward(x, prepared):
    """PyTorch-compatible forward: (B, 784) f32 -> (B, 10) f32."""
    out_padded = simple_nn_forward_padded(x, prepared)
    return out_padded[:, :OUT_FEATURES].astype(jnp.float32)


def init_params(key):
    """Deterministic init mimicking nn.Linear's uniform(-1/sqrt(fan_in), ...)."""
    k1, k2, k3, k4 = jax.random.split(key, 4)
    lim1 = 1.0 / jnp.sqrt(IN_FEATURES)
    lim2 = 1.0 / jnp.sqrt(HIDDEN)
    # Stored as (in, out) == PyTorch weight.T, so kernel does x @ W + b.
    w1 = jax.random.uniform(k1, (IN_FEATURES, HIDDEN), jnp.float32, -lim1, lim1)
    b1 = jax.random.uniform(k2, (1, HIDDEN), jnp.float32, -lim1, lim1)
    w2 = jax.random.uniform(k3, (HIDDEN, OUT_FEATURES), jnp.float32, -lim2, lim2)
    b2 = jax.random.uniform(k4, (1, OUT_FEATURES), jnp.float32, -lim2, lim2)
    return w1, b1, w2, b2


if __name__ == "__main__":
    key = jax.random.PRNGKey(0)
    k_params, k_x = jax.random.split(key)
    w1, b1, w2, b2 = init_params(k_params)
    prepared = prepare_params(w1, b1, w2, b2)   # one-time weight prep

    batch = 8
    x = jax.random.normal(k_x, (batch, IN_FEATURES), jnp.float32)

    out = simple_nn_forward(x, prepared)
    jax.block_until_ready(out)
    assert out.shape == (batch, OUT_FEATURES)

    # Reference emulating the kernel's bf16 dtype path (bf16 inputs to both
    # matmuls, f32 accumulation, bf16 output store).
    w1_e = w1.astype(jnp.bfloat16).astype(jnp.float32)
    w2_e = w2.astype(jnp.bfloat16).astype(jnp.float32)
    x_e = x.astype(jnp.bfloat16).astype(jnp.float32)
    h_ref = jnp.maximum(x_e @ w1_e + b1, 0.0)
    y_ref = h_ref.astype(jnp.bfloat16).astype(jnp.float32) @ w2_e + b2
    ref = y_ref.astype(jnp.bfloat16).astype(jnp.float32)
    assert jnp.allclose(out, ref, atol=2e-2, rtol=2e-2)

    # Also sanity-check against the pure f32 reference with a looser tolerance.
    ref_f32 = jnp.maximum(x @ w1 + b1, 0.0) @ w2 + b2
    assert jnp.allclose(out, ref_f32, atol=6e-2, rtol=6e-2)

    # Exercise a non-divisible batch to cover the partial-block masking path.
    x2 = jax.random.normal(k_x, (13, IN_FEATURES), jnp.float32)
    out2 = simple_nn_forward(x2, prepared)
    jax.block_until_ready(out2)
    ref2 = jnp.maximum(x2 @ w1 + b1, 0.0) @ w2 + b2
    assert out2.shape == (13, OUT_FEATURES)
    assert jnp.allclose(out2, ref2, atol=6e-2, rtol=6e-2)

    print("KERNEL_OK")
</pallas_src>

<mosaic_0001>
module attributes {stable_mosaic.version = 11 : i64} {
  func.func @mlp_kernel(%arg0: i32, %arg1: memref<8x784xf32, #tpu.memory_space<vmem>>, %arg2: memref<784x256xbf16, #tpu.memory_space<vmem>>, %arg3: memref<1x256xf32, #tpu.memory_space<vmem>>, %arg4: memref<256x128xbf16, #tpu.memory_space<vmem>>, %arg5: memref<1x128xf32, #tpu.memory_space<vmem>>, %arg6: memref<8x128xbf16, #tpu.memory_space<vmem>>) attributes {dimension_semantics = [#tpu.dimension_semantics<parallel>], iteration_bounds = array<i64: 1>, scalar_prefetch = 0 : i64, scratch_operands = 0 : i64, tpu.core_type = #tpu.core_type<tc>, window_params = [{transform_indices = @transform_0, window_bounds = array<i64: 8, 784>}, {pipeline_mode = #tpu.pipeline_mode<synchronous>, transform_indices = @transform_1, window_bounds = array<i64: 784, 256>}, {pipeline_mode = #tpu.pipeline_mode<synchronous>, transform_indices = @transform_2, window_bounds = array<i64: 1, 256>}, {pipeline_mode = #tpu.pipeline_mode<synchronous>, transform_indices = @transform_3, window_bounds = array<i64: 256, 128>}, {pipeline_mode = #tpu.pipeline_mode<synchronous>, transform_indices = @transform_4, window_bounds = array<i64: 1, 128>}, {transform_indices = @transform_5, window_bounds = array<i64: 8, 128>}]} {
    %c0 = arith.constant 0 : index
    %c0_0 = arith.constant 0 : index
    %0 = vector.load %arg1[%c0, %c0_0] : memref<8x784xf32, #tpu.memory_space<vmem>>, vector<8x784xf32>
    %1 = arith.truncf %0 : vector<8x784xf32> to vector<8x784xbf16>
    %c0_1 = arith.constant 0 : index
    %c0_2 = arith.constant 0 : index
    %2 = vector.load %arg2[%c0_1, %c0_2] : memref<784x256xbf16, #tpu.memory_space<vmem>>, vector<784x256xbf16>
    %cst = arith.constant dense<0.000000e+00> : vector<8x256xf32>
    %3 = tpu.matmul %1, %2, %cst {dimension_numbers = #tpu.dot_dimension_numbers<[1], [0], [0], [1], [0, 0, 1, 1], [], []>} : vector<8x784xbf16>, vector<784x256xbf16>, vector<8x256xf32> -> vector<8x256xf32>
    %c0_3 = arith.constant 0 : index
    %c0_4 = arith.constant 0 : index
    %4 = vector.load %arg3[%c0_3, %c0_4] : memref<1x256xf32, #tpu.memory_space<vmem>>, vector<1x256xf32>
    %5 = vector.broadcast %4 : vector<1x256xf32> to vector<8x256xf32>
    %6 = arith.addf %3, %5 : vector<8x256xf32>
    %cst_5 = arith.constant 0.000000e+00 : f32
    %7 = vector.broadcast %cst_5 : f32 to vector<8x256xf32>
    %8 = arith.maximumf %6, %7 : vector<8x256xf32>
    %9 = arith.truncf %8 : vector<8x256xf32> to vector<8x256xbf16>
    %c0_6 = arith.constant 0 : index
    %c0_7 = arith.constant 0 : index
    %10 = vector.load %arg4[%c0_6, %c0_7] : memref<256x128xbf16, #tpu.memory_space<vmem>>, vector<256x128xbf16>
    %cst_8 = arith.constant dense<0.000000e+00> : vector<8x128xf32>
    %11 = tpu.matmul %9, %10, %cst_8 {dimension_numbers = #tpu.dot_dimension_numbers<[1], [0], [0], [1], [0, 0, 1, 1], [], []>} : vector<8x256xbf16>, vector<256x128xbf16>, vector<8x128xf32> -> vector<8x128xf32>
    %c0_9 = arith.constant 0 : index
    %c0_10 = arith.constant 0 : index
    %12 = vector.load %arg5[%c0_9, %c0_10] : memref<1x128xf32, #tpu.memory_space<vmem>>, vector<1x128xf32>
    %13 = vector.broadcast %12 : vector<1x128xf32> to vector<8x128xf32>
    %14 = arith.addf %11, %13 : vector<8x128xf32>
    %15 = arith.truncf %14 : vector<8x128xf32> to vector<8x128xbf16>
    %c0_11 = arith.constant 0 : index
    %c0_12 = arith.constant 0 : index
    %16 = vector.load %arg6[%c0_11, %c0_12] : memref<8x128xbf16, #tpu.memory_space<vmem>>, vector<8x128xbf16>
    tpu.vector_store %arg6[%c0_11, %c0_12], %15 {strides = array<i32>} : memref<8x128xbf16, #tpu.memory_space<vmem>>, vector<8x128xbf16>,
    return
  }
  func.func @transform_0(%arg0: i32) -> (i32, i32) {
    %c0_i32 = arith.constant 0 : i32
    %c0_i32_0 = arith.constant 0 : i32
    return %arg0, %c0_i32 : i32, i32
  }
  func.func @transform_1(%arg0: i32) -> (i32, i32) {
    %c0_i32 = arith.constant 0 : i32
    %c0_i32_0 = arith.constant 0 : i32
    %c0_i32_1 = arith.constant 0 : i32
    return %c0_i32, %c0_i32_0 : i32, i32
  }
  func.func @transform_2(%arg0: i32) -> (i32, i32) {
    %c0_i32 = arith.constant 0 : i32
    %c0_i32_0 = arith.constant 0 : i32
    %c0_i32_1 = arith.constant 0 : i32
    return %c0_i32, %c0_i32_0 : i32, i32
  }
  func.func @transform_3(%arg0: i32) -> (i32, i32) {
    %c0_i32 = arith.constant 0 : i32
    %c0_i32_0 = arith.constant 0 : i32
    %c0_i32_1 = arith.constant 0 : i32
    return %c0_i32, %c0_i32_0 : i32, i32
  }
  func.func @transform_4(%arg0: i32) -> (i32, i32) {
    %c0_i32 = arith.constant 0 : i32
    %c0_i32_0 = arith.constant 0 : i32
    %c0_i32_1 = arith.constant 0 : i32
    return %c0_i32, %c0_i32_0 : i32, i32
  }
  func.func @transform_5(%arg0: i32) -> (i32, i32) {
    %c0_i32 = arith.constant 0 : i32
    %c0_i32_0 = arith.constant 0 : i32
    return %arg0, %c0_i32 : i32, i32
  }
}

</mosaic_0001>

<bundles_post_ra>
// kernel: tpu_custom_call.1
= control target key start
LH: loop header
LB: loop body
LE: loop exit
PB: predicated region body
PF: predicated region fallthrough
CT: control target
= control target key end

     0   :  { %10 = vsyncpa [#allocation3], 0  ;;  %s1494_s0 = inlined_call_operand.hbm [shape: f32[8,784], index: 0, kind: input, shape index: {}]   ;;  %s1495_s1 = inlined_call_operand.hbm [shape: bf16[784,256], index: 1, kind: input, shape index: {}]   ;;  %s1496_s2 = inlined_call_operand.vmem [shape: f32[1,256], index: 2, kind: input, shape index: {}]   ;;  %s1497_s3 = inlined_call_operand.hbm [shape: bf16[256,128], index: 3, kind: input, shape index: {}]   ;;  %s1498_s4 = inlined_call_operand.vmem [shape: f32[1,128], index: 4, kind: input, shape index: {}]   ;;  %s1499_s5 = inlined_call_operand.hbm [shape: bf16[8,128], index: 5, kind: output, shape index: {}]  }
   0x1   :  { %11 = vsyncpa [#allocation6], 0 }
   0x2   :  { %12 = vsyncpa [#allocation4], 0  ;;  %s1436_s18 = smov [#allocation5]  }
   0x3   :  { %s28_s19 = sshll.u32 %s1436_s18, 4  ;;  %s29_s19 = int_to_ptr.vmem [resolvable:$true] %s28_s19 }
   0x4   :  { %s1358_s20 = scalar_lea.vmem %s29_s19, 12544  ;;  %p1363_p1 = scmp.lt.s32.totalorder %s29_s19, %s29_s19 }
   0x5   :  { %p1359_p0 = scmp.ne.s32.totalorder %s29_s19, %s1358_s20  ;;  %p1364_p2 = scmp.lt.s32.totalorder %s1358_s20, %s1358_s20 }
   0x7   :  { %p1365_p3 = por %p1364_p2, %p1363_p1 }
   0x9   :  { %p1366_p4 = pnand %p1365_p3, %p1359_p0 }
   0xb   :  { %1369 = shalt.err (!%p1366_p4)
}
   0xc   :  { %s1437_s21 = smov 128   ;;  %s1438_s22 = smov 8  }
   0xd   :  { %34 = dma.hbm_to_vmem [thread:$0]  %s1495_s1, 12544, %s29_s19, [#allocation6], %s1437_s21, %s1437_s21, %s1438_s22  }
   0xe   :  { %s1439_s25 = smov [#allocation2]   ;;  %s1440_s27 = smov [#allocation7]  }
   0xf   :  { %s19_s26 = sshll.u32 %s1439_s25, 4  ;;  %s42_s28 = sshll.u32 %s1440_s27, 4  ;;  %s20_s26 = int_to_ptr.vmem [resolvable:$true] %s19_s26  ;;  %s43_s28 = int_to_ptr.vmem [resolvable:$true] %s42_s28 }
  0x10   :  { %s1378_s29 = scalar_lea.vmem %s20_s26, 896  ;;  %p1383_p6 = scmp.lt.s32.totalorder %s20_s26, %s20_s26 }
  0x11   :  { %p1379_p5 = scmp.ne.s32.totalorder %s20_s26, %s1378_s29  ;;  %p1384_p7 = scmp.lt.s32.totalorder %s1378_s29, %s1378_s29 }
  0x13   :  { %p1385_p8 = por %p1384_p7, %p1383_p6 }
  0x15   :  { %p1386_p9 = pnand %p1385_p8, %p1379_p5 }
  0x17   :  { %1389 = shalt.err (!%p1386_p9)
}
  0x18   :  { %22 = dma.hbm_to_vmem [thread:$0]  %s1494_s0, 896, %s20_s26, [#allocation3]  }
  0x19   :  { %s1398_s7 = scalar_lea.vmem %s43_s28, 2048  ;;  %p1403_p11 = scmp.lt.s32.totalorder %s43_s28, %s43_s28 }
  0x1a   :  { %p1399_p10 = scmp.ne.s32.totalorder %s43_s28, %s1398_s7  ;;  %p1404_p12 = scmp.lt.s32.totalorder %s1398_s7, %s1398_s7 }
  0x1c   :  { %p1405_p13 = por %p1404_p12, %p1403_p11 }
  0x1e   :  { %p1406_p0 = pnand %p1405_p13, %p1399_p10 }
  0x20   :  { %1409 = shalt.err (!%p1406_p0)
}
  0x21   :  { %s1441_s1 = smov 64   ;;  %s1442_s8 = smov 4  }
  0x22   :  { %48 = dma.hbm_to_vmem [thread:$0]  %s1497_s3, 2048, %s43_s28, [#allocation6], %s1441_s1, %s1441_s1, %s1442_s8  }
  0x23   :  { %1430 = dma.done.wait [#allocation3], 896  }
  0x24   :  { %1431 = vsyncadd [#allocation3], 4294966400 }
  0x25   :  { %1432 = dma.done.wait [#allocation6], 14592  }
  0x26   :  { %1433 = vsyncadd [#allocation6], 4294952704  ;;  %v1187_v0 = vld [vmem:[#allocation5 + $0x74] ss:$8 sps:$4 sm:$0xff]   ;;  %v1189_v1 = vld [vmem:[#allocation5 + $0x70] ss:$8 sps:$4 sm:$0xff]  }
  0x27   :  { %679 = vmatprep.subr.bf16.mxu0 %v1187_v0  ;;  %v1190_v2 = vld [vmem:[#allocation5 + $0x174] ss:$8 sps:$4 sm:$0xff]   ;;  %v1192_v3 = vld [vmem:[#allocation5 + $0x170] ss:$8 sps:$4 sm:$0xff]   ;;  %v1193_v4 = vld [vmem:[#allocation5 + $0x64] ss:$8 sps:$4 sm:$0xff]  }
  0x28   :  { %680 = vmatpush1.bf16.msra.mxu0 %v1189_v1  ;;  %v1195_v5 = vld [vmem:[#allocation5 + $0x60] ss:$8 sps:$4 sm:$0xff]   ;;  %720 = vmatprep.subr.bf16.mxu1 %v1190_v2  ;;  %v1196_v6 = vld [vmem:[#allocation5 + $0x164] ss:$8 sps:$4 sm:$0xff]   ;;  %v1199_v8 = vld [vmem:[#allocation5 + $0x54] ss:$8 sps:$4 sm:$0xff]  }
  0x29   :  { %721 = vmatpush1.bf16.msra.mxu1 %v1192_v3  ;;  %681 = vmatprep.subr.bf16.mxu0 %v1193_v4  ;;  %v1198_v7 = vld [vmem:[#allocation5 + $0x160] ss:$8 sps:$4 sm:$0xff]   ;;  %v1201_v9 = vld [vmem:[#allocation5 + $0x50] ss:$8 sps:$4 sm:$0xff]   ;;  %v1202_v10 = vld [vmem:[#allocation5 + $0x154] ss:$8 sps:$4 sm:$0xff]  }
  0x2a   :  { %722 = vmatprep.subr.bf16.mxu1 %v1196_v6  ;;  %v1205_v11 = vld [vmem:[#allocation5 + $0x44] ss:$8 sps:$4 sm:$0xff]   ;;  %v1204_v12 = vld [vmem:[#allocation5 + $0x150] ss:$8 sps:$4 sm:$0xff]   ;;  %v1207_v14 = vld [vmem:[#allocation5 + $0x40] ss:$8 sps:$4 sm:$0xff]  }
  0x2b   :  { %v1208_v13 = vld [vmem:[#allocation5 + $0x144] ss:$8 sps:$4 sm:$0xff]   ;;  %v1211_v15 = vld [vmem:[#allocation5 + $0x34] ss:$8 sps:$4 sm:$0xff]   ;;  %v1210_v16 = vld [vmem:[#allocation5 + $0x140] ss:$8 sps:$4 sm:$0xff]  }
  0x2c   :  { %682 = vmatpush1.bf16.msra.mxu0 %v1195_v5  ;;  %v1214_v17 = vld [vmem:[#allocation5 + $0x134] ss:$8 sps:$4 sm:$0xff]   ;;  %v1213_v18 = vld [vmem:[#allocation5 + $0x30] ss:$8 sps:$4 sm:$0xff]   ;;  %v1217_v19 = vld [vmem:[#allocation5 + $0x24] ss:$8 sps:$4 sm:$0xff]  }
  0x2d   :  { %683 = vmatprep.subr.bf16.mxu0 %v1199_v8  ;;  %723 = vmatpush1.bf16.msra.mxu1 %v1198_v7  ;;  %v1216_v20 = vld [vmem:[#allocation5 + $0x130] ss:$8 sps:$4 sm:$0xff]   ;;  %v1220_v21 = vld [vmem:[#allocation5 + $0x124] ss:$8 sps:$4 sm:$0xff]   ;;  %v1219_v22 = vld [vmem:[#allocation5 + $0x20] ss:$8 sps:$4 sm:$0xff]  }
  0x2e   :  { %724 = vmatprep.subr.bf16.mxu1 %v1202_v10  ;;  %v1223_v23 = vld [vmem:[#allocation5 + $0x14] ss:$8 sps:$4 sm:$0xff]   ;;  %v1222_v24 = vld [vmem:[#allocation5 + $0x120] ss:$8 sps:$4 sm:$0xff]   ;;  %v1225_v26 = vld [vmem:[#allocation5 + $0x10] ss:$8 sps:$4 sm:$0xff]  }
  0x2f   :  { %v1226_v25 = vld [vmem:[#allocation5 + $0x114] ss:$8 sps:$4 sm:$0xff]   ;;  %v1229_v27 = vld [vmem:[#allocation5 + $0x4] ss:$8 sps:$4 sm:$0xff]   ;;  %v1228_v28 = vld [vmem:[#allocation5 + $0x110] ss:$8 sps:$4 sm:$0xff]  }
  0x30   :  { %684 = vmatpush1.bf16.msra.mxu0 %v1201_v9  ;;  %v1232_v29 = vld [vmem:[#allocation5 + $0x104] ss:$8 sps:$4 sm:$0xff]   ;;  %v1231_v30 = vld [vmem:[#allocation5] ss:$8 sps:$4 sm:$0xff]   ;;  %v1235_v31 = vld [vmem:[#allocation5 + $0xf4] ss:$8 sps:$4 sm:$0xff]  }
  0x31   :  { %685 = vmatprep.subr.bf16.mxu0 %v1205_v11  ;;  %725 = vmatpush1.bf16.msra.mxu1 %v1204_v12  ;;  %v1234_v32 = vld [vmem:[#allocation5 + $0x100] ss:$8 sps:$4 sm:$0xff]   ;;  %v1238_v33 = vld [vmem:[#allocation5 + $0x1f4] ss:$8 sps:$4 sm:$0xff]   ;;  %v1237_v34 = vld [vmem:[#allocation5 + $0xf0] ss:$8 sps:$4 sm:$0xff]  }
  0x32   :  { %726 = vmatprep.subr.bf16.mxu1 %v1208_v13  ;;  %v1241_v35 = vld [vmem:[#allocation5 + $0xe4] ss:$8 sps:$4 sm:$0xff]   ;;  %v1240_v36 = vld [vmem:[#allocation5 + $0x1f0] ss:$8 sps:$4 sm:$0xff]   ;;  %v1243_v38 = vld [vmem:[#allocation5 + $0xe0] ss:$8 sps:$4 sm:$0xff]  }
  0x33   :  { %v1244_v37 = vld [vmem:[#allocation5 + $0x1e4] ss:$8 sps:$4 sm:$0xff]   ;;  %v1247_v39 = vld [vmem:[#allocation5 + $0xd4] ss:$8 sps:$4 sm:$0xff]   ;;  %v1246_v40 = vld [vmem:[#allocation5 + $0x1e0] ss:$8 sps:$4 sm:$0xff]  }
  0x34   :  { %686 = vmatpush1.bf16.msra.mxu0 %v1207_v14  ;;  %v1250_v41 = vld [vmem:[#allocation5 + $0x1d4] ss:$8 sps:$4 sm:$0xff]   ;;  %v1249_v42 = vld [vmem:[#allocation5 + $0xd0] ss:$8 sps:$4 sm:$0xff]   ;;  %v1253_v43 = vld [vmem:[#allocation5 + $0xc4] ss:$8 sps:$4 sm:$0xff]  }
  0x35   :  { %687 = vmatprep.subr.bf16.mxu0 %v1211_v15  ;;  %727 = vmatpush1.bf16.msra.mxu1 %v1210_v16  ;;  %v1252_v44 = vld [vmem:[#allocation5 + $0x1d0] ss:$8 sps:$4 sm:$0xff]   ;;  %v1256_v45 = vld [vmem:[#allocation5 + $0x1c4] ss:$8 sps:$4 sm:$0xff]   ;;  %v1255_v47 = vld [vmem:[#allocation5 + $0xc0] ss:$8 sps:$4 sm:$0xff]  }
  0x36   :  { %728 = vmatprep.subr.bf16.mxu1 %v1214_v17  ;;  %v62_v46 = vld [vmem:[#allocation2 + $0x8] sm:$0xff]  ;;  %v64_v50 = vld [vmem:[#allocation2 + $0x18] sm:$0xff]  ;;  %v61_v4 = vld [vmem:[#allocation2] sm:$0xff]  ;;  %vm675_vm0 = vcmask 130048   ;;  %s1444_s12 = smov [#allocation8]  }
  0x37   :  { %v69_v48 = vpack.c.bf16 %v62_v46, %v62_v46  ;;  %v1259_v49 = vld [vmem:[#allocation5 + $0xb4] ss:$8 sps:$4 sm:$0xff]   ;;  %v1258_v51 = vld [vmem:[#allocation5 + $0x1c0] ss:$8 sps:$4 sm:$0xff]   ;;  %v71_v52 = vpack.c.bf16 %v64_v50, %v64_v50  ;;  %v1261_v54 = vld [vmem:[#allocation5 + $0xb0] ss:$8 sps:$4 sm:$0xff]   ;;  %v68_v7 = vpack.c.bf16 %v61_v4, %v61_v4 }
  0x38   :  { %688 = vmatpush1.bf16.msra.mxu0 %v1213_v18  ;;  %v1262_v53 = vld [vmem:[#allocation5 + $0x1b4] ss:$8 sps:$4 sm:$0xff]   ;;  %v1265_v55 = vld [vmem:[#allocation5 + $0xa4] ss:$8 sps:$4 sm:$0xff]   ;;  %v1264_v56 = vld [vmem:[#allocation5 + $0x1b0] ss:$8 sps:$4 sm:$0xff]  }
  0x39   :  { %689 = vmatprep.subr.bf16.mxu0 %v1217_v19  ;;  %729 = vmatpush1.bf16.msra.mxu1 %v1216_v20  ;;  %v1268_v57 = vld [vmem:[#allocation5 + $0x1a4] ss:$8 sps:$4 sm:$0xff]   ;;  %v1267_v58 = vld [vmem:[#allocation5 + $0xa0] ss:$8 sps:$4 sm:$0xff]   ;;  %v1271_v59 = vld [vmem:[#allocation5 + $0x94] ss:$8 sps:$4 sm:$0xff]  }
  0x3a   :  { %730 = vmatprep.subr.bf16.mxu1 %v1220_v21  ;;  %711 = vmatprep.mubr.bf16.mxu0 %v69_v48  ;;  %v1270_v60 = vld [vmem:[#allocation5 + $0x1a0] ss:$8 sps:$4 sm:$0xff]   ;;  %v1274_v61 = vld [vmem:[#allocation5 + $0x194] ss:$8 sps:$4 sm:$0xff]   ;;  %v1273_v62 = vld [vmem:[#allocation5 + $0x90] ss:$8 sps:$4 sm:$0xff]  }
  0x3b   :  { %752 = vmatprep.mubr.bf16.mxu1 %v71_v52  ;;  %v1277_v63 = vld [vmem:[#allocation5 + $0x84] ss:$8 sps:$4 sm:$0xff]   ;;  %v1276_v0 = vld [vmem:[#allocation5 + $0x190] ss:$8 sps:$4 sm:$0xff]   ;;  %v1279_v1 = vld [vmem:[#allocation5 + $0x80] ss:$8 sps:$4 sm:$0xff]  }
  0x3c   :  { %690 = vmatpush1.bf16.msra.mxu0 %v1219_v22  ;;  %v1280_v2 = vld [vmem:[#allocation5 + $0x184] ss:$8 sps:$4 sm:$0xff]   ;;  %v1282_v3 = vld [vmem:[#allocation5 + $0x180] ss:$8 sps:$4 sm:$0xff]   ;;  %v1285_v5 = vld [vmem:[#allocation5 + $0x274] ss:$8 sps:$4 sm:$0xff]  }
  0x3d   :  { %691 = vmatprep.subr.bf16.mxu0 %v1223_v23  ;;  %731 = vmatpush1.bf16.msra.mxu1 %v1222_v24  ;;  %v63_v6 = vld [vmem:[#allocation2 + $0x10] sm:$0xff]  ;;  %v1288_v9 = vld [vmem:[#allocation5 + $0x264] ss:$8 sps:$4 sm:$0xff]   ;;  %v1328_v11 = vld [vmem:[#allocation5 + $0x300] ss:$8 sps:$4 sm:$0xff]   ;;  %v1443_v19 = vmov 0  }
  0x3e   :  { %732 = vmatprep.subr.bf16.mxu1 %v1226_v25  ;;  %v1283_v8 = vld [vmem:[#allocation5 + $0x270] ss:$8 sps:$4 sm:$0xff]   ;;  %v70_v10 = vpack.c.bf16 %v63_v6, %v63_v6  ;;  %v1330_v12 = vld [vmem:[#allocation5 + $0x304] ss:$8 sps:$4 sm:$0xff]   ;;  %v1286_v13 = vld [vmem:[#allocation5 + $0x260] ss:$8 sps:$4 sm:$0xff]  }
  0x3f   :  { %v1291_v14 = vld [vmem:[#allocation5 + $0x254] ss:$8 sps:$4 sm:$0xff]   ;;  %v1289_v18 = vld [vmem:[#allocation5 + $0x250] ss:$8 sps:$4 sm:$0xff]   ;;  %v1294_v20 = vld [vmem:[#allocation5 + $0x244] ss:$8 sps:$4 sm:$0xff]  }
  0x40   :  { %692 = vmatpush1.bf16.msra.mxu0 %v1225_v26  ;;  %v67_v15 = vld [vmem:[#allocation2 + $0x30] sm:$0xff]  ;;  %v66_v16 = vld [vmem:[#allocation2 + $0x28] sm:$0xff]  ;;  %v1292_v22 = vld [vmem:[#allocation5 + $0x240] ss:$8 sps:$4 sm:$0xff]   ;;  %s1030_s13 = sshll.u32 %s1444_s12, 4  ;;  %s1031_s13 = int_to_ptr.vmem [resolvable:$true] %s1030_s13 }
  0x41   :  { %693 = vmatprep.subr.bf16.mxu0 %v1229_v27  ;;  %733 = vmatpush1.bf16.msra.mxu1 %v1228_v28  ;;  %v73_v17 = vpack.c.bf16 %v66_v16, %v66_v16  ;;  %v74_v21 = vpack.c.bf16 %v67_v15, %v67_v15  ;;  %v1297_v23 = vld [vmem:[#allocation5 + $0x234] ss:$8 sps:$4 sm:$0xff]   ;;  %v1295_v24 = vld [vmem:[#allocation5 + $0x230] ss:$8 sps:$4 sm:$0xff]   ;;  %v1300_v25 = vld [vmem:[#allocation5 + $0x224] ss:$8 sps:$4 sm:$0xff]   ;;  %p1415_p2 = scmp.lt.s32.totalorder %s1031_s13, %s1031_s13 }
  0x42   :  { %734 = vmatprep.subr.bf16.mxu1 %v1232_v29  ;;  %v1298_v26 = vld [vmem:[#allocation5 + $0x220] ss:$8 sps:$4 sm:$0xff]   ;;  %v1303_v27 = vld [vmem:[#allocation5 + $0x214] ss:$8 sps:$4 sm:$0xff]   ;;  %v1301_v28 = vld [vmem:[#allocation5 + $0x210] ss:$8 sps:$4 sm:$0xff]  }
  0x43   :  { %v1306_v29 = vld [vmem:[#allocation5 + $0x204] ss:$8 sps:$4 sm:$0xff]   ;;  %v1331_v46 = vld [vmem:[#allocation5 + $0x280] ss:$8 sps:$4 sm:$0xff]   ;;  %s1410_s14 = scalar_lea.vmem %s1031_s13, 64 }
  0x44   :  { %694 = vmatpush1.bf16.msra.mxu0 %v1231_v30  ;;  %v1304_v30 = vld [vmem:[#allocation5 + $0x200] ss:$8 sps:$4 sm:$0xff]   ;;  %p1411_p1 = scmp.ne.s32.totalorder %s1031_s13, %s1410_s14  ;;  %p1416_p3 = scmp.lt.s32.totalorder %s1410_s14, %s1410_s14 }
  0x45   :  { %695 = vmatprep.subr.bf16.mxu0 %v1235_v31  ;;  %735 = vmatpush1.bf16.msra.mxu1 %v1234_v32  ;;  %v1309_v31 = vld [vmem:[#allocation5 + $0x2f4] ss:$8 sps:$4 sm:$0xff]   ;;  %v1307_v32 = vld [vmem:[#allocation5 + $0x2f0] ss:$8 sps:$4 sm:$0xff]   ;;  %v1335_v50 = vld [vmem:[#allocation7 + $0x38] sm:$0xff]  }
  0x46   :  { %736 = vmatprep.subr.bf16.mxu1 %v1238_v33  ;;  %v1312_v33 = vld [vmem:[#allocation5 + $0x2e4] ss:$8 sps:$4 sm:$0xff]   ;;  %v173_v16 = vld [vmem:[%s1496_s2] sm:$0x3]  ;;  %p1417_p4 = por %p1416_p3, %p1415_p2 }
  0x47   :  { %v1337_v52 = vld [vmem:[#allocation7 + $0x30] sm:$0xff]  }
  0x48   :  { %696 = vmatpush2.bf16.msra.mxu0 %v1237_v34  ;;  %v1310_v34 = vld [vmem:[#allocation5 + $0x2e0] ss:$8 sps:$4 sm:$0xff]   ;;  %p1418_p5 = pnand %p1417_p4, %p1411_p1 }
  0x49   :  { %697 = vmatprep.subr.bf16.mxu0 %v1241_v35  ;;  %737 = vmatpush2.bf16.msra.mxu1 %v1240_v36  ;;  %v1315_v35 = vld [vmem:[#allocation5 + $0x2d4] ss:$8 sps:$4 sm:$0xff]   ;;  %v1313_v36 = vld [vmem:[#allocation5 + $0x2d0] ss:$8 sps:$4 sm:$0xff]  }
  0x4a   :  { %738 = vmatprep.subr.bf16.mxu1 %v1244_v37  ;;  %v1318_v37 = vld [vmem:[#allocation5 + $0x2c4] ss:$8 sps:$4 sm:$0xff]  }
  0x4c   :  { %698 = vmatpush2.bf16.msra.mxu0 %v1243_v38  ;;  %v1316_v38 = vld [vmem:[#allocation5 + $0x2c0] ss:$8 sps:$4 sm:$0xff]  }
  0x4d   :  { %699 = vmatprep.subr.bf16.mxu0 %v1247_v39  ;;  %739 = vmatpush2.bf16.msra.mxu1 %v1246_v40  ;;  %v1321_v39 = vld [vmem:[#allocation5 + $0x2b4] ss:$8 sps:$4 sm:$0xff]   ;;  %v1319_v40 = vld [vmem:[#allocation5 + $0x2b0] ss:$8 sps:$4 sm:$0xff]  }
  0x4e   :  { %740 = vmatprep.subr.bf16.mxu1 %v1250_v41  ;;  %v1324_v41 = vld [vmem:[#allocation5 + $0x2a4] ss:$8 sps:$4 sm:$0xff]  }
  0x50   :  { %700 = vmatpush2.bf16.msra.mxu0 %v1249_v42  ;;  %v1322_v42 = vld [vmem:[#allocation5 + $0x2a0] ss:$8 sps:$4 sm:$0xff]  }
  0x51   :  { %701 = vmatprep.subr.bf16.mxu0 %v1253_v43  ;;  %741 = vmatpush2.bf16.msra.mxu1 %v1252_v44  ;;  %v1327_v43 = vld [vmem:[#allocation5 + $0x294] ss:$8 sps:$4 sm:$0xff]   ;;  %v1325_v44 = vld [vmem:[#allocation5 + $0x290] ss:$8 sps:$4 sm:$0xff]  }
  0x52   :  { %742 = vmatprep.subr.bf16.mxu1 %v1256_v45  ;;  %v1333_v45 = vld [vmem:[#allocation5 + $0x284] ss:$8 sps:$4 sm:$0xff]  }
  0x54   :  { %702 = vmatpush2.bf16.msra.mxu0 %v1255_v47  ;;  %v65_v47 = vld [vmem:[#allocation2 + $0x20] sm:$0xff] }
  0x55   :  { %703 = vmatprep.subr.bf16.mxu0 %v1259_v49  ;;  %743 = vmatpush2.bf16.msra.mxu1 %v1258_v51  ;;  %v72_v48 = vpack.c.bf16 %v65_v47, %v65_v47  ;;  %v1334_v49 = vld [vmem:[#allocation7 + $0x78] sm:$0xff]   ;;  %v1336_v51 = vld [vmem:[#allocation7 + $0x70] sm:$0xff]  }
  0x56   :  { %744 = vmatprep.subr.bf16.mxu1 %v1262_v53  ;;  %v1338_v53 = vld [vmem:[#allocation7 + $0x68] sm:$0xff]  }
  0x58   :  { %704 = vmatpush2.bf16.msra.mxu0 %v1261_v54  ;;  %v1339_v54 = vld [vmem:[#allocation7 + $0x28] sm:$0xff]  }
  0x59   :  { %705 = vmatprep.subr.bf16.mxu0 %v1265_v55  ;;  %745 = vmatpush2.bf16.msra.mxu1 %v1264_v56  ;;  %v1340_v55 = vld [vmem:[#allocation7 + $0x60] sm:$0xff]  }
  0x5a   :  { %746 = vmatprep.subr.bf16.mxu1 %v1268_v57  ;;  %v1341_v56 = vld [vmem:[#allocation7 + $0x20] sm:$0xff]   ;;  %v1342_v57 = vld [vmem:[#allocation7 + $0x58] sm:$0xff]  }
  0x5c   :  { %706 = vmatpush2.bf16.msra.mxu0 %v1267_v58  ;;  %v1343_v58 = vld [vmem:[#allocation7 + $0x18] sm:$0xff]  }
  0x5d   :  { %707 = vmatprep.subr.bf16.mxu0 %v1271_v59  ;;  %747 = vmatpush2.bf16.msra.mxu1 %v1270_v60  ;;  %v1344_v59 = vld [vmem:[#allocation7 + $0x50] sm:$0xff]  }
  0x5e   :  { %748 = vmatprep.subr.bf16.mxu1 %v1274_v61  ;;  %v1345_v60 = vld [vmem:[#allocation7 + $0x10] sm:$0xff]   ;;  %v1346_v61 = vld [vmem:[#allocation7 + $0x48] sm:$0xff]  }
  0x60   :  { %708 = vmatpush2.bf16.msra.mxu0 %v1273_v62  ;;  %v1347_v62 = vld [vmem:[#allocation7 + $0x8] sm:$0xff]  }
  0x61   :  { %709 = vmatprep.subr.bf16.mxu0 %v1277_v63  ;;  %749 = vmatpush2.bf16.msra.mxu1 %v1276_v0  ;;  %v1348_v63 = vld [vmem:[#allocation7 + $0x40] sm:$0xff]  }
  0x62   :  { %750 = vmatprep.subr.bf16.mxu1 %v1280_v2  ;;  %v1349_v0 = vld [vmem:[#allocation7] sm:$0xff]  }
  0x64   :  { %710 = vmatpush2.bf16.msra.mxu0 %v1279_v1 }
  0x65   :  { %761 = vmatprep.subr.bf16.mxu0 %v1285_v5  ;;  %751 = vmatpush2.bf16.msra.mxu1 %v1282_v3 }
  0x66   :  { %816 = vmatprep.subr.bf16.mxu1 %v1330_v12 }
  0x67   :  { %712 = vmatmul.mubr.bf16.vlgmr.msra.gmra.mxu0 %v68_v7 }
  0x68   :  { %762 = vmatpush1.bf16.msra.mxu0 %v1283_v8  ;;  %753 = vmatmul.mubr.bf16.vlgmr.msra.gmra.mxu1 %v70_v10 }
  0x69   :  { %763 = vmatprep.subr.bf16.mxu0 %v1288_v9  ;;  %817 = vmatpush1.bf16.msra.mxu1 %v1328_v11 }
  0x6a   :  { %834 = vmatprep.mubr.bf16.mxu1 %v1443_v19  ;;  %793 = vmatprep.mubr.bf16.mxu0 %v73_v17 }
  0x6b   :  { %1156 = vmatprep.subr.bf16.mxu1 %v1334_v49 }
  0x6c   :  { %764 = vmatpush1.bf16.msra.mxu0 %v1286_v13  ;;  %v175_v13 = vlaneseq }
  0x6d   :  { %765 = vmatprep.subr.bf16.mxu0 %v1291_v14 }
  0x6e   :  { %v176_v14 = vshrl.u32 %v175_v13, 7 }
  0x70   :  { %766 = vmatpush1.bf16.msra.mxu0 %v1289_v18  ;;  %1138 = vmatmul.mubr.msk.bf16.vlgmr.msra.gmra.mxu1 %vm675_vm0, %v74_v21  ;;  %v177_v15 = vsub.s32 0, %v176_v14  ;;  %v181_v17 = vsub.s32 1, %v176_v14 }
  0x71   :  { %767 = vmatprep.subr.bf16.mxu0 %v1294_v20  ;;  %1157 = vmatpush3.bf16.msra.mxu1 %v1335_v50 }
  0x72   :  { %1158 = vmatprep.subr.bf16.mxu1 %v1336_v51  ;;  %v178_v18 = vrot.slane %v173_v16, %v177_v15  ;;  %v182_v19 = vrot.slane %v173_v16, %v181_v17 }
  0x74   :  { %768 = vmatpush1.bf16.msra.mxu0 %v1292_v22 }
  0x75   :  { %769 = vmatprep.subr.bf16.mxu0 %v1297_v23  ;;  %1159 = vmatpush3.bf16.msra.mxu1 %v1337_v52 }
  0x76   :  { %1160 = vmatprep.subr.bf16.mxu1 %v1338_v53 }
  0x78   :  { %770 = vmatpush1.bf16.msra.mxu0 %v1295_v24 }
  0x79   :  { %771 = vmatprep.subr.bf16.mxu0 %v1300_v25  ;;  %1161 = vmatpush3.bf16.msra.mxu1 %v1339_v54 }
  0x7a   :  { %1162 = vmatprep.subr.bf16.mxu1 %v1340_v55 }
  0x7c   :  { %772 = vmatpush1.bf16.msra.mxu0 %v1298_v26 }
  0x7d   :  { %773 = vmatprep.subr.bf16.mxu0 %v1303_v27  ;;  %1163 = vmatpush3.bf16.msra.mxu1 %v1341_v56 }
  0x7e   :  { %1164 = vmatprep.subr.bf16.mxu1 %v1342_v57 }
  0x80   :  { %774 = vmatpush1.bf16.msra.mxu0 %v1301_v28 }
  0x81   :  { %775 = vmatprep.subr.bf16.mxu0 %v1306_v29  ;;  %1165 = vmatpush3.bf16.msra.mxu1 %v1343_v58 }
  0x82   :  { %1166 = vmatprep.subr.bf16.mxu1 %v1344_v59 }
  0x84   :  { %776 = vmatpush1.bf16.msra.mxu0 %v1304_v30 }
  0x85   :  { %777 = vmatprep.subr.bf16.mxu0 %v1309_v31  ;;  %1167 = vmatpush3.bf16.msra.mxu1 %v1345_v60 }
  0x86   :  { %1168 = vmatprep.subr.bf16.mxu1 %v1346_v61 }
  0x88   :  { %778 = vmatpush2.bf16.msra.mxu0 %v1307_v32 }
  0x89   :  { %779 = vmatprep.subr.bf16.mxu0 %v1312_v33  ;;  %1169 = vmatpush3.bf16.msra.mxu1 %v1347_v62 }
  0x8a   :  { %1170 = vmatprep.subr.bf16.mxu1 %v1348_v63 }
  0x8c   :  { %780 = vmatpush2.bf16.msra.mxu0 %v1310_v34 }
  0x8d   :  { %781 = vmatprep.subr.bf16.mxu0 %v1315_v35  ;;  %1171 = vmatpush3.bf16.msra.mxu1 %v1349_v0 }
  0x90   :  { %782 = vmatpush2.bf16.msra.mxu0 %v1313_v36 }
  0x91   :  { %783 = vmatprep.subr.bf16.mxu0 %v1318_v37  ;;  %v1139_v37 = vld [vmem:[%s1498_s4] ss:$0 sm:$0xff] }
  0x94   :  { %784 = vmatpush2.bf16.msra.mxu0 %v1316_v38 }
  0x95   :  { %785 = vmatprep.subr.bf16.mxu0 %v1321_v39 }
  0x98   :  { %786 = vmatpush2.bf16.msra.mxu0 %v1319_v40 }
  0x99   :  { %787 = vmatprep.subr.bf16.mxu0 %v1324_v41 }
  0x9c   :  { %788 = vmatpush2.bf16.msra.mxu0 %v1322_v42 }
  0x9d   :  { %789 = vmatprep.subr.bf16.mxu0 %v1327_v43 }
  0xa0   :  { %790 = vmatpush2.bf16.msra.mxu0 %v1325_v44 }
  0xa1   :  { %791 = vmatprep.subr.bf16.mxu0 %v1333_v45 }
  0xa4   :  { %792 = vmatpush2.bf16.msra.mxu0 %v1331_v46 }
  0xa7   :  { %794 = vmatmul.mubr.bf16.vlgmr.msra.gmra.mxu0 %v72_v48 }
 0x127   :  { %v713_v1 = vpop.f32.mrf.mxu0 }
 0x128   :  { %v754_v3 = vpop.f32.mrf.mxu1  ;;  %v714_v20 = vadd.f32 %v713_v1, %v178_v18 }
 0x129   :  { %v715_v2 = vpop.f32.mrf.mxu0 }
 0x12a   :  { %v756_v5 = vpop.f32.mrf.mxu1  ;;  %v716_v21 = vadd.f32 %v715_v2, %v182_v19  ;;  %v755_v22 = vadd.f32 %v754_v3, %v714_v20 }
 0x12b   :  { %v717_v4 = vpop.f32.mrf.mxu0 }
 0x12c   :  { %v758_v7 = vpop.f32.mrf.mxu1  ;;  %v757_v24 = vadd.f32 %v756_v5, %v716_v21 }
 0x12d   :  { %v718_v6 = vpop.f32.mrf.mxu0 }
 0x12e   :  { %v759_v8 = vpop.f32.mrf.mxu1 }
 0x130   :  { %v836_v9 = vpop.f32.mrf.mxu1 }
 0x132   :  { %v838_v10 = vpop.f32.mrf.mxu1 }
 0x134   :  { %v840_v11 = vpop.f32.mrf.mxu1 }
 0x136   :  { %v841_v12 = vpop.f32.mrf.mxu1 }
 0x167   :  { %v795_v23 = vpop.f32.mrf.mxu0 }
 0x168   :  { %v796_v25 = vadd.f32 %v795_v23, %v755_v22 }
 0x169   :  { %v797_v26 = vpop.f32.mrf.mxu0 }
 0x16a   :  { %v837_v27 = vadd.f32 %v836_v9, %v796_v25  ;;  %v798_v28 = vadd.f32 %v797_v26, %v757_v24 }
 0x16b   :  { %v799_v29 = vpop.f32.mrf.mxu0 }
 0x16c   :  { %v839_v30 = vadd.f32 %v838_v10, %v798_v28  ;;  %v843_v31 = vmax.f32 %v837_v27, 0.0 }
 0x16d   :  { %v800_v32 = vpop.f32.mrf.mxu0 }
 0x16e   :  { %v844_v33 = vmax.f32 %v839_v30, 0.0  ;;  %v845_v35 = vpack.c.bf16 %v843_v31, %v843_v31 }
 0x170   :  { %v846_v34 = vpack.c.bf16 %v844_v33, %v844_v33 }
 0x172   :  { %1014 = vmatprep.mubr.bf16.mxu1 %v846_v34 }
 0x173   :  { %1015 = vmatmul.mubr.bf16.vlgmr.msra.gmra.mxu1 %v845_v35 }
 0x233   :  { %v1172_v36 = vpop.f32.mrf.mxu1 }
 0x235   :  { %v1173_v38 = vpop.f32.mrf.mxu1 }
 0x236   :  { %v1174_v39 = vadd.f32 %v1173_v38, %v1172_v36 }
 0x237   :  { %v1175_v40 = vpop.f32.mrf.mxu1 }
 0x238   :  { %v1017_v41 = vadd.f32 %v1174_v39, %v1139_v37 }
 0x239   :  { %v1176_v42 = vpop.f32.mrf.mxu1 }
 0x23a   :  { %v1022_v43 = vpack.c.bf16 %v1017_v41, %v1017_v41 }
 0x23c   :  { %1023 = vst [vmem:[#allocation8] sm:$0xf] %v1022_v43 }
 0x23d   :  { %1421 = shalt.err (!%p1418_p5)
}
 0x23e   :  { %1033 = dma.vmem_to_hbm [thread:$0]  %s1031_s13, 64, %s1499_s5, [#allocation4]  }
 0x23f   :  { %1434 = dma.done.wait [#allocation4], 64  }
 0x240   :  { %1435 = vsyncadd [#allocation4], 4294967232 }
 0x241   :  { %1037 = vsyncpa [#allocation3], 1 }
 0x242   :  { %1038 = vsyncpa [#allocation6], 1 }
 0x243   :  { %1039 = vsyncpa [#allocation4], 1 }

</bundles_post_ra>
